<compile_context>
chip_gen: v5e
topology: v5e:2x2
jax: 0.10.0
libtpu: 0.0.40
codegen_flags: <defaults>
</compile_context>

<pallas_src>
import functools

import jax
import jax.numpy as jnp
from jax.experimental import pallas as pl


SUBLANE = 8
LANE = 128


def _round_up(x, m):
    return (x + m - 1) // m * m


def _full_spec(shape):
    # grid=() -> single invocation; the block covers the whole array.
    return pl.BlockSpec(shape, lambda: (0,) * len(shape))


# ----------------------------------------------------------------------------
# Fused kernel: L-layer LSTM step + Linear + LogSoftmax
# ----------------------------------------------------------------------------
def fused_decoder_kernel(y_ref, state_ref, w_ih_ref, w_hh_ref, b_ref,
                         w_lin_ref, b_lin_ref,
                         logp_ref, state_out_ref,
                         *, num_layers, hidden_dim):
    """One decode step, all layers fused; inter-layer activations stay in vregs.

    y_ref         : (Bp, Dp)         step input, lane-padded to Dp = max(V, H)
    state_ref     : (Bp, L*2*H)      packed [h0, c0, h1, c1, ...] previous state
    w_ih_ref      : (L, Dp, 4H)      W_ih^T per layer (zero filler rows past d_in)
    w_hh_ref      : (L, H, 4H)       W_hh^T per layer
    b_ref         : (L, 1, 4H)       b_ih + b_hh per layer
    w_lin_ref     : (H, Vp)          projection weight, lane-padded
    b_lin_ref     : (1, Vp)          projection bias (pad lanes = -1e30)
    logp_ref      : (Bp, Vp)         output log-probabilities (lane-dense)
    state_out_ref : (Bp, L*2*H)      packed new state (aliases the state input)
    """
    H = hidden_dim
    Bp, Dp = y_ref.shape

    # Lane mask selecting the g-gate (pure tanh) lanes of the packed 4H gate vector.
    lane = jax.lax.broadcasted_iota(jnp.int32, (Bp, 4 * H), 1)
    is_g = (lane >= 2 * H) & (lane < 3 * H)

    x = y_ref[...]                               # (Bp, Dp)
    top_h = None
    new_state = []
    for layer in range(num_layers):              # static unroll (L is small)
        h_prev = state_ref[:, layer * 2 * H:layer * 2 * H + H]
        c_prev = state_ref[:, layer * 2 * H + H:(layer + 1) * 2 * H]

        # Two single-pass MXU dots; no concat scratch / masked staging stores.
        gates = (jnp.dot(x, w_ih_ref[layer], preferred_element_type=jnp.float32)
                 + jnp.dot(h_prev, w_hh_ref[layer],
                           preferred_element_type=jnp.float32)
                 + b_ref[layer])

        # Single EUP pass over the packed gate vreg: sigmoid(x) = 0.5*(1+tanh(x/2)).
        scaled = jnp.where(is_g, gates, 0.5 * gates)
        t = jnp.tanh(scaled)
        acts = jnp.where(is_g, t, 0.5 * t + 0.5)

        i = acts[:, 0 * H:1 * H]
        f = acts[:, 1 * H:2 * H]
        g = acts[:, 2 * H:3 * H]
        o = acts[:, 3 * H:4 * H]

        c_new = f * c_prev + i * g
        h_new = o * jnp.tanh(c_new)

        new_state.append(h_new)
        new_state.append(c_new)
        top_h = h_new

        x = h_new                                # feeds the next layer (in vregs)
        if layer + 1 < num_layers and Dp > H:    # only needed when vocab > hidden
            x = jnp.pad(x, ((0, 0), (0, Dp - H)))

    # One lane-dense (Bp, L*2*H) store instead of 2L masked 32-lane stores.
    state_out_ref[...] = jnp.concatenate(new_state, axis=1)

    # Linear projection (lane-padded vocab) + log-softmax, fused.
    # TODO(synk): tile this over a v_pad grid axis for large vocab / v7x VMEM (64 MiB).
    logits = (jnp.dot(top_h, w_lin_ref[...], preferred_element_type=jnp.float32)
              + b_lin_ref[...])
    m = jnp.max(logits, axis=-1, keepdims=True)
    z = logits - m
    lse = jnp.log(jnp.sum(jnp.exp(z), axis=-1, keepdims=True))
    logp_ref[...] = z - lse


# ----------------------------------------------------------------------------
# Packed-layout single step (the layout to carry across a decode loop)
# ----------------------------------------------------------------------------
def decoder_step_packed(params, y_p, state_p):
    """One decode step on padded/packed operands.

    y_p     : (Bp, Dp)       lane-padded step input
    state_p : (Bp, L*2*H)    packed [h0, c0, h1, c1, ...]
    returns (logp_p (Bp, Vp), new_state_p (Bp, L*2*H)); state is updated in place
    via input_output_aliases, so carry `new_state_p` directly to the next step.
    """
    V, H, L, d_pad, v_pad = params["dims"]
    Bp = y_p.shape[0]

    kernel = functools.partial(fused_decoder_kernel, num_layers=L, hidden_dim=H)

    logp_p, state_new = pl.pallas_call(
        kernel,
        out_shape=(jax.ShapeDtypeStruct((Bp, v_pad), jnp.float32),
                   jax.ShapeDtypeStruct((Bp, L * 2 * H), jnp.float32)),
        in_specs=[_full_spec((Bp, d_pad)),
                  _full_spec((Bp, L * 2 * H)),
                  _full_spec(params["w_ih"].shape),
                  _full_spec(params["w_hh"].shape),
                  _full_spec(params["b"].shape),
                  _full_spec(params["w_lin"].shape),
                  _full_spec(params["b_lin"].shape)],
        out_specs=(_full_spec((Bp, v_pad)),
                   _full_spec((Bp, L * 2 * H))),
        input_output_aliases={1: 1},             # packed state updated in place
    )(y_p, state_p, params["w_ih"], params["w_hh"], params["b"],
      params["w_lin"], params["b_lin"])
    return logp_p, state_new


# ----------------------------------------------------------------------------
# Pack / unpack helpers (do these ONCE around a decode loop, not per step)
# ----------------------------------------------------------------------------
def pack_state(hidden, cell, Bp):
    L, B, H = hidden.shape
    s = jnp.stack([hidden, cell], axis=1)                      # (L, 2, B, H)
    s = jnp.transpose(s, (2, 0, 1, 3)).reshape(B, L * 2 * H)   # (B, L*2*H)
    return jnp.zeros((Bp, L * 2 * H), jnp.float32).at[:B].set(s)


def unpack_state(state_p, B, L, H):
    s = state_p[:B].reshape(B, L, 2, H)
    s = jnp.transpose(s, (1, 2, 0, 3))                         # (L, 2, B, H)
    return s[:, 0], s[:, 1]


# ----------------------------------------------------------------------------
# Module-equivalent wrapper
# ----------------------------------------------------------------------------
def decoder_forward(params, y, hidden, cell):
    """Equivalent of Decoder.forward for rnn_type='lstm' (dropout in eval mode).

    y      : (B, V)
    hidden : (L, B, H)
    cell   : (L, B, H)
    returns (prediction (1, B, V), hidden (L, B, H), cell (L, B, H))

    For multi-step decoding, call decoder_step_packed inside the loop instead
    (pad/pack once before, unpack once after).
    """
    V, H, L, d_pad, v_pad = params["dims"]
    B = y.shape[0]
    Bp = _round_up(max(B, SUBLANE), SUBLANE)

    y_p = jnp.zeros((Bp, d_pad), jnp.float32).at[:B, :V].set(y)
    state_p = pack_state(hidden, cell, Bp)

    logp_p, state_new = decoder_step_packed(params, y_p, state_p)

    h_new, c_new = unpack_state(state_new, B, L, H)
    prediction = logp_p[:B, :V][None]            # (1, B, V) -- seq dim of 1
    return prediction, h_new, c_new


# ----------------------------------------------------------------------------
# Deterministic parameter init (PyTorch-style U(-1/sqrt(H), 1/sqrt(H)))
# ----------------------------------------------------------------------------
def init_params(key, vocab_size, hidden_dim, num_layers):
    V, H, L = vocab_size, hidden_dim, num_layers
    bound = 1.0 / (H ** 0.5)
    d_pad = max(V, H)               # uniform input width across layers (zero filler)
    v_pad = _round_up(V, LANE)      # lane-dense projection output

    w_ih_stack, w_hh_stack, b_stack = [], [], []
    for layer in range(L):
        d_in = V if layer == 0 else H
        key, k1, k2, k3, k4 = jax.random.split(key, 5)
        w_ih = jax.random.uniform(k1, (4 * H, d_in), jnp.float32, -bound, bound)
        w_hh = jax.random.uniform(k2, (4 * H, H), jnp.float32, -bound, bound)
        b_ih = jax.random.uniform(k3, (4 * H,), jnp.float32, -bound, bound)
        b_hh = jax.random.uniform(k4, (4 * H,), jnp.float32, -bound, bound)
        w_ih_t = (jnp.zeros((d_pad, 4 * H), jnp.float32)
                  .at[:d_in].set(jnp.transpose(w_ih)))
        w_ih_stack.append(w_ih_t)
        w_hh_stack.append(jnp.transpose(w_hh))
        b_stack.append((b_ih + b_hh)[None, :])

    key, k1, k2 = jax.random.split(key, 3)
    w_lin = jax.random.uniform(k1, (V, H), jnp.float32, -bound, bound)
    b_lin = jax.random.uniform(k2, (V,), jnp.float32, -bound, bound)
    w_lin_p = jnp.zeros((H, v_pad), jnp.float32).at[:, :V].set(jnp.transpose(w_lin))
    # Pad-lane bias of -1e30 -> exp underflows to exactly 0, so log-softmax of the
    # real lanes is identical to the unpadded computation.
    b_lin_p = jnp.full((1, v_pad), -1e30, jnp.float32).at[0, :V].set(b_lin)

    # TODO(synk): on v6e/v7x cast w_ih/w_hh/w_lin to bfloat16 (keep accumulation and
    # elementwise math in f32) and loosen the allclose tolerance to ~1e-2.
    return {
        "w_ih": jnp.stack(w_ih_stack, axis=0),   # (L, d_pad, 4H)
        "w_hh": jnp.stack(w_hh_stack, axis=0),   # (L, H, 4H)
        "b": jnp.stack(b_stack, axis=0),         # (L, 1, 4H)
        "w_lin": w_lin_p,                        # (H, v_pad)
        "b_lin": b_lin_p,                        # (1, v_pad)
        "dims": (V, H, L, d_pad, v_pad),
    }


# ----------------------------------------------------------------------------
# Pure-JAX reference (for a sanity check)
# ----------------------------------------------------------------------------
def decoder_forward_ref(params, y, hidden, cell):
    V, H, L, d_pad, _ = params["dims"]
    x = jnp.pad(y, ((0, 0), (0, d_pad - V)))
    new_h, new_c = [], []
    for layer in range(L):
        gates = (x @ params["w_ih"][layer] + hidden[layer] @ params["w_hh"][layer]
                 + params["b"][layer])
        i = jax.nn.sigmoid(gates[:, 0 * H:1 * H])
        f = jax.nn.sigmoid(gates[:, 1 * H:2 * H])
        g = jnp.tanh(gates[:, 2 * H:3 * H])
        o = jax.nn.sigmoid(gates[:, 3 * H:4 * H])
        c_new = f * cell[layer] + i * g
        h_new = o * jnp.tanh(c_new)
        new_h.append(h_new)
        new_c.append(c_new)
        x = jnp.pad(h_new, ((0, 0), (0, d_pad - H)))
    logits = new_h[-1] @ params["w_lin"][:, :V] + params["b_lin"][:, :V]
    logp = jax.nn.log_softmax(logits, axis=-1)
    return logp[None], jnp.stack(new_h, 0), jnp.stack(new_c, 0)


# ----------------------------------------------------------------------------
# Main
# ----------------------------------------------------------------------------
if __name__ == "__main__":
    # conf: rnn_type='lstm', rnn_layers=2, rnn_hidden=32, vocab_size=16, dropout=0.0
    B, V, H, L = 2, 16, 32, 2

    key = jax.random.PRNGKey(0)
    kp, ky, kh, kc = jax.random.split(key, 4)

    params = init_params(kp, V, H, L)
    y = jax.random.normal(ky, (B, V), jnp.float32)
    hidden = jax.random.normal(kh, (L, B, H), jnp.float32)
    cell = jax.random.normal(kc, (L, B, H), jnp.float32)

    pred, h_new, c_new = decoder_forward(params, y, hidden, cell)
    jax.block_until_ready((pred, h_new, c_new))

    pred_r, h_r, c_r = decoder_forward_ref(params, y, hidden, cell)
    assert jnp.allclose(pred, pred_r, atol=1e-4, rtol=1e-4)
    assert jnp.allclose(h_new, h_r, atol=1e-4, rtol=1e-4)
    assert jnp.allclose(c_new, c_r, atol=1e-4, rtol=1e-4)

    print("KERNEL_OK")
</pallas_src>

<mosaic_0001>
module attributes {stable_mosaic.version = 11 : i64} {
  func.func @fused_decoder_kernel(%arg0: memref<8x32xf32, #tpu.memory_space<vmem>>, %arg1: memref<8x128xf32, #tpu.memory_space<vmem>>, %arg2: memref<2x32x128xf32, #tpu.memory_space<vmem>>, %arg3: memref<2x32x128xf32, #tpu.memory_space<vmem>>, %arg4: memref<2x1x128xf32, #tpu.memory_space<vmem>>, %arg5: memref<32x128xf32, #tpu.memory_space<vmem>>, %arg6: memref<1x128xf32, #tpu.memory_space<vmem>>, %arg7: memref<8x128xf32, #tpu.memory_space<vmem>>, %arg8: memref<8x128xf32, #tpu.memory_space<vmem>>) attributes {dimension_semantics = [], scalar_prefetch = 0 : i64, scratch_operands = 0 : i64, tpu.core_type = #tpu.core_type<tc>} {
    %0 = tpu.iota {dimensions = array<i32: 1>} : vector<8x128xi32>
    %c64_i32 = arith.constant 64 : i32
    %1 = vector.broadcast %c64_i32 : i32 to vector<8x128xi32>
    %2 = arith.cmpi sge, %0, %1 : vector<8x128xi32>
    %c96_i32 = arith.constant 96 : i32
    %3 = vector.broadcast %c96_i32 : i32 to vector<8x128xi32>
    %4 = arith.cmpi slt, %0, %3 : vector<8x128xi32>
    %5 = arith.andi %2, %4 : vector<8x128xi1>
    %c0 = arith.constant 0 : index
    %c0_0 = arith.constant 0 : index
    %6 = vector.load %arg0[%c0, %c0_0] : memref<8x32xf32, #tpu.memory_space<vmem>>, vector<8x32xf32>
    %c0_1 = arith.constant 0 : index
    %c0_2 = arith.constant 0 : index
    %7 = vector.load %arg1[%c0_1, %c0_2] : memref<8x128xf32, #tpu.memory_space<vmem>>, vector<8x32xf32>
    %c0_3 = arith.constant 0 : index
    %c32 = arith.constant 32 : index
    %8 = vector.load %arg1[%c0_3, %c32] : memref<8x128xf32, #tpu.memory_space<vmem>>, vector<8x32xf32>
    %c0_4 = arith.constant 0 : index
    %c0_5 = arith.constant 0 : index
    %c0_6 = arith.constant 0 : index
    %9 = vector.load %arg2[%c0_4, %c0_5, %c0_6] : memref<2x32x128xf32, #tpu.memory_space<vmem>>, vector<1x32x128xf32>
    %10 = vector.shape_cast %9 : vector<1x32x128xf32> to vector<32x128xf32>
    %cst = arith.constant dense<0.000000e+00> : vector<8x128xf32>
    %11 = tpu.matmul %6, %10, %cst {dimension_numbers = #tpu.dot_dimension_numbers<[1], [0], [0], [1], [0, 0, 1, 1], [], []>} : vector<8x32xf32>, vector<32x128xf32>, vector<8x128xf32> -> vector<8x128xf32>
    %c0_7 = arith.constant 0 : index
    %c0_8 = arith.constant 0 : index
    %c0_9 = arith.constant 0 : index
    %12 = vector.load %arg3[%c0_7, %c0_8, %c0_9] : memref<2x32x128xf32, #tpu.memory_space<vmem>>, vector<1x32x128xf32>
    %13 = vector.shape_cast %12 : vector<1x32x128xf32> to vector<32x128xf32>
    %cst_10 = arith.constant dense<0.000000e+00> : vector<8x128xf32>
    %14 = tpu.matmul %7, %13, %cst_10 {dimension_numbers = #tpu.dot_dimension_numbers<[1], [0], [0], [1], [0, 0, 1, 1], [], []>} : vector<8x32xf32>, vector<32x128xf32>, vector<8x128xf32> -> vector<8x128xf32>
    %15 = arith.addf %11, %14 : vector<8x128xf32>
    %c0_11 = arith.constant 0 : index
    %c0_12 = arith.constant 0 : index
    %c0_13 = arith.constant 0 : index
    %16 = vector.load %arg4[%c0_11, %c0_12, %c0_13] : memref<2x1x128xf32, #tpu.memory_space<vmem>>, vector<1x1x128xf32>
    %17 = vector.shape_cast %16 : vector<1x1x128xf32> to vector<1x128xf32>
    %18 = vector.broadcast %17 : vector<1x128xf32> to vector<8x128xf32>
    %19 = arith.addf %15, %18 : vector<8x128xf32>
    %cst_14 = arith.constant 5.000000e-01 : f32
    %20 = vector.broadcast %cst_14 : f32 to vector<8x128xf32>
    %21 = arith.mulf %20, %19 : vector<8x128xf32>
    %22 = arith.select %5, %19, %21 : vector<8x128xi1>, vector<8x128xf32>
    %23 = math.tanh %22 : vector<8x128xf32>
    %cst_15 = arith.constant 5.000000e-01 : f32
    %24 = vector.broadcast %cst_15 : f32 to vector<8x128xf32>
    %25 = arith.mulf %24, %23 : vector<8x128xf32>
    %cst_16 = arith.constant 5.000000e-01 : f32
    %26 = vector.broadcast %cst_16 : f32 to vector<8x128xf32>
    %27 = arith.addf %25, %26 : vector<8x128xf32>
    %28 = arith.select %5, %23, %27 : vector<8x128xi1>, vector<8x128xf32>
    %29 = vector.extract_strided_slice %28 {offsets = [0, 0], sizes = [8, 32], strides = [1, 1]} : vector<8x128xf32> to vector<8x32xf32>
    %30 = vector.extract_strided_slice %28 {offsets = [0, 32], sizes = [8, 32], strides = [1, 1]} : vector<8x128xf32> to vector<8x32xf32>
    %31 = vector.extract_strided_slice %28 {offsets = [0, 64], sizes = [8, 32], strides = [1, 1]} : vector<8x128xf32> to vector<8x32xf32>
    %32 = vector.extract_strided_slice %28 {offsets = [0, 96], sizes = [8, 32], strides = [1, 1]} : vector<8x128xf32> to vector<8x32xf32>
    %33 = arith.mulf %30, %8 : vector<8x32xf32>
    %34 = arith.mulf %29, %31 : vector<8x32xf32>
    %35 = arith.addf %33, %34 : vector<8x32xf32>
    %36 = math.tanh %35 : vector<8x32xf32>
    %37 = arith.mulf %32, %36 : vector<8x32xf32>
    %c0_17 = arith.constant 0 : index
    %c64 = arith.constant 64 : index
    %38 = vector.load %arg1[%c0_17, %c64] : memref<8x128xf32, #tpu.memory_space<vmem>>, vector<8x32xf32>
    %c0_18 = arith.constant 0 : index
    %c96 = arith.constant 96 : index
    %39 = vector.load %arg1[%c0_18, %c96] : memref<8x128xf32, #tpu.memory_space<vmem>>, vector<8x32xf32>
    %c1 = arith.constant 1 : index
    %c0_19 = arith.constant 0 : index
    %c0_20 = arith.constant 0 : index
    %40 = vector.load %arg2[%c1, %c0_19, %c0_20] : memref<2x32x128xf32, #tpu.memory_space<vmem>>, vector<1x32x128xf32>
    %41 = vector.shape_cast %40 : vector<1x32x128xf32> to vector<32x128xf32>
    %cst_21 = arith.constant dense<0.000000e+00> : vector<8x128xf32>
    %42 = tpu.matmul %37, %41, %cst_21 {dimension_numbers = #tpu.dot_dimension_numbers<[1], [0], [0], [1], [0, 0, 1, 1], [], []>} : vector<8x32xf32>, vector<32x128xf32>, vector<8x128xf32> -> vector<8x128xf32>
    %c1_22 = arith.constant 1 : index
    %c0_23 = arith.constant 0 : index
    %c0_24 = arith.constant 0 : index
    %43 = vector.load %arg3[%c1_22, %c0_23, %c0_24] : memref<2x32x128xf32, #tpu.memory_space<vmem>>, vector<1x32x128xf32>
    %44 = vector.shape_cast %43 : vector<1x32x128xf32> to vector<32x128xf32>
    %cst_25 = arith.constant dense<0.000000e+00> : vector<8x128xf32>
    %45 = tpu.matmul %38, %44, %cst_25 {dimension_numbers = #tpu.dot_dimension_numbers<[1], [0], [0], [1], [0, 0, 1, 1], [], []>} : vector<8x32xf32>, vector<32x128xf32>, vector<8x128xf32> -> vector<8x128xf32>
    %46 = arith.addf %42, %45 : vector<8x128xf32>
    %c1_26 = arith.constant 1 : index
    %c0_27 = arith.constant 0 : index
    %c0_28 = arith.constant 0 : index
    %47 = vector.load %arg4[%c1_26, %c0_27, %c0_28] : memref<2x1x128xf32, #tpu.memory_space<vmem>>, vector<1x1x128xf32>
    %48 = vector.shape_cast %47 : vector<1x1x128xf32> to vector<1x128xf32>
    %49 = vector.broadcast %48 : vector<1x128xf32> to vector<8x128xf32>
    %50 = arith.addf %46, %49 : vector<8x128xf32>
    %cst_29 = arith.constant 5.000000e-01 : f32
    %51 = vector.broadcast %cst_29 : f32 to vector<8x128xf32>
    %52 = arith.mulf %51, %50 : vector<8x128xf32>
    %53 = arith.select %5, %50, %52 : vector<8x128xi1>, vector<8x128xf32>
    %54 = math.tanh %53 : vector<8x128xf32>
    %cst_30 = arith.constant 5.000000e-01 : f32
    %55 = vector.broadcast %cst_30 : f32 to vector<8x128xf32>
    %56 = arith.mulf %55, %54 : vector<8x128xf32>
    %cst_31 = arith.constant 5.000000e-01 : f32
    %57 = vector.broadcast %cst_31 : f32 to vector<8x128xf32>
    %58 = arith.addf %56, %57 : vector<8x128xf32>
    %59 = arith.select %5, %54, %58 : vector<8x128xi1>, vector<8x128xf32>
    %60 = vector.extract_strided_slice %59 {offsets = [0, 0], sizes = [8, 32], strides = [1, 1]} : vector<8x128xf32> to vector<8x32xf32>
    %61 = vector.extract_strided_slice %59 {offsets = [0, 32], sizes = [8, 32], strides = [1, 1]} : vector<8x128xf32> to vector<8x32xf32>
    %62 = vector.extract_strided_slice %59 {offsets = [0, 64], sizes = [8, 32], strides = [1, 1]} : vector<8x128xf32> to vector<8x32xf32>
    %63 = vector.extract_strided_slice %59 {offsets = [0, 96], sizes = [8, 32], strides = [1, 1]} : vector<8x128xf32> to vector<8x32xf32>
    %64 = arith.mulf %61, %39 : vector<8x32xf32>
    %65 = arith.mulf %60, %62 : vector<8x32xf32>
    %66 = arith.addf %64, %65 : vector<8x32xf32>
    %67 = math.tanh %66 : vector<8x32xf32>
    %68 = arith.mulf %63, %67 : vector<8x32xf32>
    %69 = tpu.concatenate %37, %35, %68, %66 in 1 : vector<8x32xf32>, vector<8x32xf32>, vector<8x32xf32>, vector<8x32xf32> -> vector<8x128xf32>
    %c0_32 = arith.constant 0 : index
    %c0_33 = arith.constant 0 : index
    %70 = vector.load %arg8[%c0_32, %c0_33] : memref<8x128xf32, #tpu.memory_space<vmem>>, vector<8x128xf32>
    tpu.vector_store %arg8[%c0_32, %c0_33], %69 {strides = array<i32>} : memref<8x128xf32, #tpu.memory_space<vmem>>, vector<8x128xf32>,
    %c0_34 = arith.constant 0 : index
    %c0_35 = arith.constant 0 : index
    %71 = vector.load %arg5[%c0_34, %c0_35] : memref<32x128xf32, #tpu.memory_space<vmem>>, vector<32x128xf32>
    %cst_36 = arith.constant dense<0.000000e+00> : vector<8x128xf32>
    %72 = tpu.matmul %68, %71, %cst_36 {dimension_numbers = #tpu.dot_dimension_numbers<[1], [0], [0], [1], [0, 0, 1, 1], [], []>} : vector<8x32xf32>, vector<32x128xf32>, vector<8x128xf32> -> vector<8x128xf32>
    %c0_37 = arith.constant 0 : index
    %c0_38 = arith.constant 0 : index
    %73 = vector.load %arg6[%c0_37, %c0_38] : memref<1x128xf32, #tpu.memory_space<vmem>>, vector<1x128xf32>
    %74 = vector.broadcast %73 : vector<1x128xf32> to vector<8x128xf32>
    %75 = arith.addf %72, %74 : vector<8x128xf32>
    %cst_39 = arith.constant dense<0xFF800000> : vector<8xf32>
    %76 = vector.multi_reduction <maximumf>, %75, %cst_39 [1] : vector<8x128xf32> to vector<8xf32>
    %77 = vector.shape_cast %76 : vector<8xf32> to vector<8x1xf32>
    %78 = vector.broadcast %77 : vector<8x1xf32> to vector<8x128xf32>
    %79 = arith.subf %75, %78 : vector<8x128xf32>
    %80 = math.exp %79 : vector<8x128xf32>
    %cst_40 = arith.constant dense<0.000000e+00> : vector<8xf32>
    %81 = vector.multi_reduction <add>, %80, %cst_40 [1] : vector<8x128xf32> to vector<8xf32>
    %82 = vector.shape_cast %81 : vector<8xf32> to vector<8x1xf32>
    %83 = math.log %82 : vector<8x1xf32>
    %84 = vector.broadcast %83 : vector<8x1xf32> to vector<8x128xf32>
    %85 = arith.subf %79, %84 : vector<8x128xf32>
    %c0_41 = arith.constant 0 : index
    %c0_42 = arith.constant 0 : index
    %86 = vector.load %arg7[%c0_41, %c0_42] : memref<8x128xf32, #tpu.memory_space<vmem>>, vector<8x128xf32>
    tpu.vector_store %arg7[%c0_41, %c0_42], %85 {strides = array<i32>} : memref<8x128xf32, #tpu.memory_space<vmem>>, vector<8x128xf32>,
    return
  }
}

</mosaic_0001>

<bundles_post_ra>
// kernel: tpu_custom_call.1
= control target key start
LH: loop header
LB: loop body
LE: loop exit
PB: predicated region body
PF: predicated region fallthrough
CT: control target
= control target key end

     0   :  { %14 = vsyncpa [#allocation3], 0  ;;  %s667_s0 = inlined_call_operand.vmem [shape: f32[8,32], index: 0, kind: input, shape index: {}]   ;;  %s668_s1 = inlined_call_operand.hbm [shape: f32[8,128], index: 1, kind: input, shape index: {}, may-alias: {1,8}]   ;;  %s669_s2 = inlined_call_operand.hbm [shape: f32[2,32,128], index: 2, kind: input, shape index: {}]   ;;  %s670_s3 = inlined_call_operand.hbm [shape: f32[2,32,128], index: 3, kind: input, shape index: {}]   ;;  %s671_s4 = inlined_call_operand.vmem [shape: f32[2,1,128], index: 4, kind: input, shape index: {}]   ;;  %s672_s5 = inlined_call_operand.hbm [shape: f32[32,128], index: 5, kind: input, shape index: {}]   ;;  %s673_s6 = inlined_call_operand.vmem [shape: f32[1,128], index: 6, kind: input, shape index: {}]   ;;  %s674_s7 = inlined_call_operand.hbm [shape: f32[8,128], index: 7, kind: output, shape index: {0}]   ;;  %s675_s8 = inlined_call_operand.hbm [shape: f32[8,128], index: 8, kind: output, shape index: {1}, may-alias: {1,8}]  }
   0x1   :  { %15 = vsyncpa [#allocation6], 0 }
   0x2   :  { %16 = vsyncpa [#allocation9], 0 }
   0x3   :  { %17 = vsyncpa [#allocation4], 0  ;;  %s36_s29 = sshll.u32 %s669_s2, 4  ;;  %s37_s29 = int_to_ptr.hbm [resolvable:$true] %s36_s29 }
   0x4   :  { %18 = vsyncpa [#allocation12], 0  ;;  %s549_s30 = smov [#allocation5]   ;;  %s26_s12 = sshll.u32 %s668_s1, 4  ;;  %s27_s12 = int_to_ptr.hbm [resolvable:$true] %s26_s12 }
   0x5   :  { %s38_s9 = sshll.u32 %s549_s30, 4  ;;  %s550_s13 = smov 128   ;;  %s39_s9 = int_to_ptr.vmem [resolvable:$true] %s38_s9 }
   0x6   :  { %s551_s14 = smov 8   ;;  %s552_s15 = smov [#allocation2]  }
   0x7   :  { %44 = dma.hbm_to_vmem [thread:$0]  %s37_s29, 1024, %s39_s9, [#allocation6], %s550_s13, %s550_s13, %s551_s14  }
   0x8   :  { %s28_s16 = sshll.u32 %s552_s15, 4  ;;  %s49_s19 = sshll.u32 %s670_s3, 4  ;;  %s29_s16 = int_to_ptr.vmem [resolvable:$true] %s28_s16  ;;  %s50_s19 = int_to_ptr.hbm [resolvable:$true] %s49_s19 }
   0x9   :  { %31 = dma.hbm_to_vmem [thread:$0]  %s27_s12, 128, %s29_s16, [#allocation3]  }
   0xa   :  { %s64_s21 = sshll.u32 %s672_s5, 4  ;;  %s553_s22 = smov [#allocation7]   ;;  %s65_s21 = int_to_ptr.hbm [resolvable:$true] %s64_s21 }
   0xb   :  { %s51_s23 = sshll.u32 %s553_s22, 4  ;;  %s554_s1 = smov [#allocation8]   ;;  %s52_s23 = int_to_ptr.vmem [resolvable:$true] %s51_s23 }
   0xc   :  { %57 = dma.hbm_to_vmem [thread:$0]  %s50_s19, 1024, %s52_s23, [#allocation6], %s550_s13, %s550_s13, %s551_s14  }
   0xd   :  { %s66_s24 = sshll.u32 %s554_s1, 4  ;;  %s67_s24 = int_to_ptr.vmem [resolvable:$true] %s66_s24 }
   0xe   :  { %72 = dma.hbm_to_vmem [thread:$0]  %s65_s21, 512, %s67_s24, [#allocation9], %s550_s13, %s550_s13, %s551_s14  }
   0xf   :  { %539 = dma.done.wait [#allocation3], 128  }
  0x10   :  { %540 = vsyncadd [#allocation3], 4294967168 }
  0x11   :  { %541 = dma.done.wait [#allocation6], 2048  }
  0x12   :  { %542 = vsyncadd [#allocation6], 4294965248 }
  0x13   :  { %543 = dma.done.wait [#allocation9], 512  }
  0x14   :  { %544 = vsyncadd [#allocation9], 4294966784  ;;  %v105_v0 = vld [vmem:[#allocation7 + $0x18] sm:$0xff]  ;;  %v104_v2 = vld [vmem:[#allocation7 + $0x10] sm:$0xff]  ;;  %vm106_vm0 = vcmask 261120   ;;  %v91_v10 = vlaneseq  ;;  %s556_s27 = smov 32  }
  0x15   :  { %v101_v1 = vld [vmem:[#allocation5 + $0x18] sm:$0xff]  ;;  %122 = vmatpush.msra.mxu0 %v105_v0  ;;  %v100_v3 = vld [vmem:[#allocation5 + $0x10] sm:$0xff]  ;;  %v103_v4 = vld [vmem:[#allocation7 + $0x8] sm:$0xff]  ;;  %vm280_vm4 = vcmask 523264   ;;  %vm282_vm5 = vcmask 785408   ;;  %s558_s10 = smov [#allocation11]  }
  0x16   :  { %145 = vmatpush.msra.mxu1 %v101_v1  ;;  %v99_v5 = vld [vmem:[#allocation5 + $0x8] sm:$0xff]  ;;  %v102_v6 = vld [vmem:[#allocation7] sm:$0xff]  ;;  %v97_v8 = vld [vmem:[#allocation2] sm:$0xff]  ;;  %v92_v11 = vand.u32 127, %v91_v10  ;;  %s344_s11 = sshll.u32 %s558_s10, 4  ;;  %s346_s14 = sshll.u32 %s675_s8, 4  ;;  %s345_s11 = int_to_ptr.vmem [resolvable:$true] %s344_s11  ;;  %s347_s14 = int_to_ptr.hbm [resolvable:$true] %s346_s14 }
  0x17   :  { %123 = vmatpush.msra.mxu0 %v104_v2  ;;  %v98_v7 = vld [vmem:[#allocation5] sm:$0xff]  ;;  %v96_v9 = vld [vmem:[%s667_s0] sm:$0xff]  ;;  %s555_s0 = smov 64   ;;  %v189_v32 = vld [vmem:[#allocation7 + $0x30] sm:$0xff]  ;;  %s335_s18 = sshll.u32 %s674_s7, 4  ;;  %s336_s18 = int_to_ptr.hbm [resolvable:$true] %s335_s18 }
  0x18   :  { %146 = vmatpush.msra.mxu1 %v100_v3  ;;  %v380_v12 = vld [vmem:[%s671_s4] ss:$0 sm:$0xff]  ;;  %vm93_vm1 = vcmp.ge.s32.totalorder %v92_v11, 64  ;;  %vm94_vm2 = vcmp.lt.s32.totalorder %v92_v11, 96  ;;  %v184_v33 = vld [vmem:[#allocation5 + $0x30] sm:$0xff]  ;;  %v188_v34 = vld [vmem:[#allocation7 + $0x28] sm:$0xff] }
  0x19   :  { %124 = vmatpush.msra.mxu0 %v103_v4  ;;  %vm625_vm3 = vmand %vm93_vm1, %vm94_vm2  ;;  %v190_v30 = vld [vmem:[#allocation7 + $0x38] sm:$0xff]  ;;  %v183_v35 = vld [vmem:[#allocation5 + $0x28] sm:$0xff] }
  0x1a   :  { %147 = vmatpush.msra.mxu1 %v99_v5  ;;  %v185_v31 = vld [vmem:[#allocation5 + $0x38] sm:$0xff]  ;;  %207 = vmatpush.msra.mxu2 %v190_v30  ;;  %v187_v36 = vld [vmem:[#allocation7 + $0x20] sm:$0xff]  ;;  %v287_v60 = vld [vmem:[#allocation8 + $0x10] sm:$0xff] }
  0x1b   :  { %125 = vmatpush.msra.mxu0 %v102_v6  ;;  %232 = vmatpush.msra.mxu3 %v185_v31  ;;  %v182_v37 = vld [vmem:[#allocation5 + $0x20] sm:$0xff]  ;;  %v381_v43 = vld [vmem:[%s671_s4 + $0x1] ss:$0 sm:$0xff]  ;;  %v286_v61 = vld [vmem:[#allocation8 + $0x8] sm:$0xff]  ;;  %s557_s4 = smov 96  }
  0x1c   :  { %148 = vmatpush.msra.mxu1 %v98_v7  ;;  %363 = vmatmul.msk.f32.vlgmr.msra.gmra.mxu0 %vm106_vm0, %v97_v8  ;;  %v288_v59 = vld [vmem:[#allocation8 + $0x18] sm:$0xff]  ;;  %v285_v62 = vld [vmem:[#allocation8] sm:$0xff] }
  0x1d   :  { %364 = vmatmul.msk.f32.vlgmr.msra.gmra.mxu1 %vm106_vm0, %v96_v9  ;;  %208 = vmatpush.msra.mxu2 %v189_v32  ;;  %v382_v7 = vld [vmem:[%s673_s6] ss:$0 sm:$0xff]  ;;  %s559_s6 = smov [#allocation10]  }
  0x1e   :  { %233 = vmatpush.msra.mxu3 %v184_v33  ;;  %309 = vmatpush.msrb.mxu0 %v288_v59  ;;  %s333_s15 = sshll.u32 %s559_s6, 4  ;;  %s334_s15 = int_to_ptr.vmem [resolvable:$true] %s333_s15 }
  0x1f   :  { %209 = vmatpush.msra.mxu2 %v188_v34 }
  0x20   :  { %234 = vmatpush.msra.mxu3 %v183_v35  ;;  %310 = vmatpush.msrb.mxu0 %v287_v60 }
  0x21   :  { %210 = vmatpush.msra.mxu2 %v187_v36 }
  0x22   :  { %235 = vmatpush.msra.mxu3 %v182_v37  ;;  %311 = vmatpush.msrb.mxu0 %v286_v61 }
  0x24   :  { %312 = vmatpush.msrb.mxu0 %v285_v62 }
  0x99   :  { %v127_v13 = vpop.f32.mrf.mxu0 }
  0x9a   :  { %v150_v14 = vpop.f32.mrf.mxu1 }
  0x9b   :  { %v151_v15 = vadd.f32 %v150_v14, %v127_v13 }
  0x9d   :  { %v157_v16 = vadd.f32 %v380_v12, %v151_v15 }
  0x9f   :  { %v158_v18 = vmul.f32 0.5, %v157_v16 }
  0xa1   :  { %v159_v19 = vsel %vm625_vm3, %v157_v16, %v158_v18 }
  0xa2   :  { %383 = vtanh.f32 %v159_v19 }
  0xa8   :  { %v384_v20 = vpop.eup %383 }
  0xa9   :  { %v161_v21 = vmul.f32 0.5, %v384_v20 }
  0xab   :  { %v162_v22 = vadd.f32 0.5, %v161_v21 }
  0xad   :  { %v163_v23 = vsel %vm625_vm3, %v384_v20, %v162_v22 }
  0xae   :  { %166 = vrot.lane.b32.xlu0 %v163_v23, %s555_s0  ;;  %v164_v26 = vmul.f32 %v163_v23, %v97_v8 }
 0x120   :  { %v167_v24 = vpop.permute.xlu0 %166 }
 0x121   :  { %v169_v25 = vmul.f32 %v167_v24, %v163_v23 }
 0x123   :  { %171 = vrot.lane.b32.xlu0 %v169_v25, %s556_s27 }
 0x195   :  { %v172_v27 = vpop.permute.xlu0 %171 }
 0x196   :  { %v635_v28 = vadd.f32 %v172_v27, %v164_v26 }
 0x198   :  { %385 = vtanh.f32 %v635_v28 }
 0x19e   :  { %v386_v29 = vpop.eup %385 }
 0x19f   :  { %177 = vrot.lane.b32.xlu1 %v386_v29, %s555_s0 }
 0x1a7   :  { %191 = vrot.lane.b32.xlu1 %v97_v8, %s555_s0 }
 0x211   :  { %v178_v38 = vpop.permute.xlu1 %177 }
 0x212   :  { %v180_v39 = vmul.f32 %v178_v38, %v163_v23 }
 0x214   :  { %216 = vrot.lane.b32.xlu2 %v180_v39, %s556_s27 }
 0x219   :  { %v192_v40 = vpop.permute.xlu1 %191 }
 0x21a   :  { %365 = vmatmul.msk.f32.vlgmr.msra.gmra.mxu2 %vm106_vm0, %v192_v40 }
 0x26e   :  { %v217_v41 = vpop.permute.xlu2 %216 }
 0x26f   :  { %366 = vmatmul.msk.f32.vlgmr.msra.gmra.mxu3 %vm106_vm0, %v217_v41  ;;  %v279_v3 = vsel %vm106_vm0, %v217_v41, %v635_v28 }
 0x29d   :  { %v212_v42 = vpop.f32.mrf.mxu2 }
 0x2f2   :  { %v237_v44 = vpop.f32.mrf.mxu3 }
 0x2f3   :  { %v238_v45 = vadd.f32 %v237_v44, %v212_v42 }
 0x2f5   :  { %v245_v46 = vadd.f32 %v381_v43, %v238_v45 }
 0x2f7   :  { %v246_v47 = vmul.f32 0.5, %v245_v46 }
 0x2f9   :  { %v247_v48 = vsel %vm625_vm3, %v245_v46, %v246_v47 }
 0x2fa   :  { %387 = vtanh.f32 %v247_v48 }
 0x300   :  { %v388_v49 = vpop.eup %387 }
 0x301   :  { %v249_v50 = vmul.f32 0.5, %v388_v49 }
 0x303   :  { %v250_v51 = vadd.f32 0.5, %v249_v50 }
 0x305   :  { %v251_v52 = vsel %vm625_vm3, %v388_v49, %v250_v51 }
 0x306   :  { %255 = vrot.lane.b32.xlu2 %v251_v52, %s555_s0  ;;  %v253_v55 = vmul.f32 %v251_v52, %v192_v40 }
 0x360   :  { %v256_v53 = vpop.permute.xlu2 %255 }
 0x361   :  { %v258_v54 = vmul.f32 %v256_v53, %v251_v52 }
 0x363   :  { %260 = vrot.lane.b32.xlu0 %v258_v54, %s556_s27 }
 0x3d5   :  { %v261_v56 = vpop.permute.xlu0 %260 }
 0x3d6   :  { %v263_v57 = vadd.f32 %v261_v56, %v253_v55 }
 0x3d8   :  { %389 = vtanh.f32 %v263_v57 }
 0x3de   :  { %v390_v58 = vpop.eup %389 }
 0x3df   :  { %266 = vrot.lane.b32.xlu1 %v390_v58, %s555_s0 }
 0x451   :  { %v267_v63 = vpop.permute.xlu1 %266 }
 0x452   :  { %v269_v0 = vmul.f32 %v267_v63, %v251_v52 }
 0x454   :  { %293 = vrot.lane.b32.xlu2 %v269_v0, %s556_s27 }
 0x45c   :  { %272 = vrot.lane.b32.xlu2 %v269_v0, %s557_s4 }
 0x464   :  { %276 = vrot.lane.b32.xlu2 %v263_v57, %s555_s0 }
 0x4ae   :  { %v294_v1 = vpop.permute.xlu2 %293 }
 0x4af   :  { %368 = vmatmul.msk.f32.vlgmr.msrb.gmra.mxu0 %vm106_vm0, %v294_v1 }
 0x4b6   :  { %v273_v2 = vpop.permute.xlu2 %272 }
 0x4b7   :  { %v281_v4 = vsel %vm280_vm4, %v279_v3, %v273_v2 }
 0x4be   :  { %v277_v5 = vpop.permute.xlu2 %276 }
 0x4bf   :  { %v283_v6 = vsel %vm282_vm5, %v281_v4, %v277_v5 }
 0x4c0   :  { %284 = vst [vmem:[#allocation11] sm:$0xff] %v283_v6 }
 0x4c1   :  { %349 = dma.vmem_to_hbm [thread:$0]  %s345_s11, 128, %s347_s14, [#allocation12]  }
 0x52c   :  { %v314_v8 = vpop.f32.mrf.mxu0 }
 0x52d   :  { %v315_v9 = vadd.f32 %v382_v7, %v314_v8 }
 0x52f   :  { %317 = vmax.xlane.f32.xlu0 %v315_v9 }
 0x5a2   :  { %v318_v10 = vpop.xlane.xlu0 %317 }
 0x5a3   :  { %v319_v11 = vsub.f32 %v315_v9, %v318_v10 }
 0x5a5   :  { %v320_v12 = vmul.f32 1.442695, %v319_v11 }
 0x5a7   :  { %391 = vpow2.f32 %v320_v12 }
 0x5ad   :  { %v392_v13 = vpop.eup %391 }
 0x5ae   :  { %322 = vadd.xlane.f32.xlu1 %v392_v13 }
 0x621   :  { %v323_v14 = vpop.xlane.xlu1 %322 }
 0x622   :  { %393 = vlog2.f32 %v323_v14 }
 0x628   :  { %v394_v15 = vpop.eup %393 }
 0x629   :  { %v325_v16 = vmul.f32 0.6931472, %v394_v15 }
 0x62b   :  { %v326_v17 = vsub.f32 %v319_v11, %v325_v16 }
 0x62d   :  { %327 = vst [vmem:[#allocation10] sm:$0xff] %v326_v17 }
 0x62e   :  { %338 = dma.vmem_to_hbm [thread:$0]  %s334_s15, 128, %s336_s18, [#allocation4]  }
 0x62f   :  { %545 = dma.done.wait [#allocation4], 128  }
 0x630   :  { %546 = vsyncadd [#allocation4], 4294967168 }
 0x631   :  { %547 = dma.done.wait [#allocation12], 128  }
 0x632   :  { %548 = vsyncadd [#allocation12], 4294967168 }
 0x633   :  { %358 = vsyncpa [#allocation3], 1 }
 0x634   :  { %359 = vsyncpa [#allocation6], 1 }
 0x635   :  { %360 = vsyncpa [#allocation9], 1 }
 0x636   :  { %361 = vsyncpa [#allocation4], 1 }
 0x637   :  { %362 = vsyncpa [#allocation12], 1 }

</bundles_post_ra>
